<compile_context>
chip_gen: v7x
topology: tpu7x:2x2x1
jax: 0.10.0
libtpu: 0.0.40
codegen_flags: <defaults>
</compile_context>

<pallas_src>
import functools

import jax
import jax.numpy as jnp
from jax.experimental import pallas as pl
from jax.experimental.pallas import tpu as pltpu


def _round_up(a, m):
    return ((a + m - 1) // m) * m


def _cdiv(a, b):
    return -(-a // b)


def _chip_config():
    """Returns (lane_target, vmem_budget_bytes, vmem_limit_bytes)."""
    try:
        kind = jax.devices()[0].device_kind.lower()
    except Exception:  # pragma: no cover - defensive
        kind = ""
    old_mxu = any(t in kind for t in ("v2", "v3", "v4", "v5"))     # 128x128 MXU
    big_vmem = any(t in kind for t in ("v4", "v5", "v6"))          # 128 MiB VMEM/TC
    lane_target = 128 if old_mxu else 256
    if big_vmem:
        return lane_target, 80 << 20, 100 << 20
    # v7x (64 MiB physical VMEM) or unknown: stay conservative.
    return lane_target, 32 << 20, 48 << 20


def _conv1x1_kernel(x_ref, w_ref, b_ref, o_ref, *, bf16_matmul):
    # x_ref: (tm, K_eff), w_ref: (K_eff, N_eff), b_ref: (1, N_eff), o_ref: (tm, N_eff)
    x = x_ref[...]
    w = w_ref[...]
    if bf16_matmul:
        x = x.astype(jnp.bfloat16)
        w = w.astype(jnp.bfloat16)
    acc = jnp.dot(x, w, preferred_element_type=jnp.float32)
    o_ref[...] = (acc + b_ref[...].astype(jnp.float32)).astype(o_ref.dtype)


def text_preprocess(x, weight, bias, *, tm=4096, out_dtype=None, bf16_matmul=False):
    """x: [B, L, C_in], weight: [C_out, C_in], bias: [C_out] -> [B, L, C_out]."""
    B, L, C_in = x.shape
    C_out, C_in_w = weight.shape
    assert C_in_w == C_in, "weight / input channel mismatch"
    if out_dtype is None:
        out_dtype = x.dtype

    M = B * L
    itemsize = jnp.dtype(x.dtype).itemsize
    lane_target, vmem_budget, vmem_limit = _chip_config()

    # ---- lane packing: fold k sequence positions per row so the output lane
    # width hits the MXU / store-path native width (128 on v5e, 256 on v6e/v7x)
    # and the contraction is wide.  All packing reshapes are contiguous. ----
    if 0 < C_out < lane_target and lane_target % C_out == 0:
        k = lane_target // C_out
    else:
        k = 1  # slow path (masked stores) when C_out doesn't divide nicely.
    # Block-diagonal weight grows ~k^2; cap it so it stays cheaply VMEM-resident.
    while k > 1 and (k * C_in) * (k * C_out) * itemsize > (4 << 20):
        k //= 2
    K_eff = k * C_in
    N_eff = k * C_out

    # ---- packed-row count: pad only to a multiple of 8*k rows (sublane
    # alignment).  The grid uses cdiv, so no padding up to the tile size. ----
    rows = _round_up(_cdiv(M, k), 8)
    M_pad = rows * k

    # ---- row tiling: keep >= 2 (and even) grid steps for megacore sharding,
    # then shrink to the per-generation VMEM budget. ----
    tm = max(8, _round_up(tm, 8))
    nsteps = _cdiv(rows, tm)
    if nsteps == 1 and rows > 8:
        nsteps = 2
    elif nsteps > 1 and nsteps % 2 == 1:
        nsteps += 1
    tm_eff = max(8, _round_up(_cdiv(rows, nsteps), 8))

    def _vmem_est(t):
        # double-buffered x/out tiles + double-buffered resident weight & bias
        return 2 * itemsize * (t * K_eff + t * N_eff + K_eff * N_eff + N_eff)

    while tm_eff > 8 and _vmem_est(tm_eff) > vmem_budget:
        tm_eff = max(8, _round_up(tm_eff // 2, 8))

    grid = (_cdiv(rows, tm_eff),)

    # ---- operand prep (contiguous reshapes; tiny pad only if M % (8*k) != 0) ----
    x_flat = x.reshape(M, C_in)
    if M_pad != M:
        x_flat = jnp.pad(x_flat, ((0, M_pad - M), (0, 0)))
    x_packed = x_flat.reshape(rows, K_eff)

    w_t = weight.T  # [C_in, C_out]: MXU-native RHS layout, transposed once on host
    if k == 1:
        w_eff = w_t
    else:
        # kron(I_k, W^T): block-diagonal [k*C_in, k*C_out]; tiny for small channels.
        w_eff = jnp.kron(jnp.eye(k, dtype=weight.dtype), w_t)
    b_eff = jnp.tile(bias, k).reshape(1, N_eff)

    cost = pl.CostEstimate(
        flops=2 * M * C_in * C_out,
        transcendentals=0,
        bytes_accessed=itemsize * (rows * K_eff + K_eff * N_eff + N_eff)
        + jnp.dtype(out_dtype).itemsize * rows * N_eff,
    )

    out_packed = pl.pallas_call(
        functools.partial(_conv1x1_kernel, bf16_matmul=bf16_matmul),
        out_shape=jax.ShapeDtypeStruct((rows, N_eff), out_dtype),
        grid_spec=pltpu.PrefetchScalarGridSpec(
            num_scalar_prefetch=0,
            grid=grid,
            in_specs=[
                pl.BlockSpec((tm_eff, K_eff), lambda i: (i, 0)),
                # Weight / bias are grid-invariant and stay VMEM-resident
                # (footprint is capped at <=4 MiB above and accounted in the
                # VMEM budget).
                pl.BlockSpec((K_eff, N_eff), lambda i: (0, 0)),
                pl.BlockSpec((1, N_eff), lambda i: (0, 0)),
            ],
            out_specs=pl.BlockSpec((tm_eff, N_eff), lambda i: (i, 0)),
        ),
        compiler_params=pltpu.CompilerParams(
            dimension_semantics=("parallel",),
            vmem_limit_bytes=vmem_limit,
        ),
        cost_estimate=cost,
    )(x_packed, w_eff, b_eff)

    # Unpack: contiguous reshape back to per-position rows; the slice is a no-op
    # when M was already a multiple of 8*k.
    out_flat = out_packed.reshape(M_pad, C_out)
    if M_pad != M:
        out_flat = out_flat[:M]
    return out_flat.reshape(B, L, C_out)


if __name__ == "__main__":
    B, L = 2, 8
    in_channel, out_channel = 32, 32

    key = jax.random.PRNGKey(0)
    kx, kw, kb = jax.random.split(key, 3)

    # Conv1d(k=1) params with the kernel-size axis squeezed:
    # weight [C_out, C_in], bias [C_out].
    bound = 1.0 / (in_channel ** 0.5)
    weight = jax.random.uniform(kw, (out_channel, in_channel),
                                minval=-bound, maxval=bound, dtype=jnp.float32)
    bias = jax.random.uniform(kb, (out_channel,),
                              minval=-bound, maxval=bound, dtype=jnp.float32)

    x = jax.random.normal(kx, (B, L, in_channel), dtype=jnp.float32)

    out = text_preprocess(x, weight, bias)
    out = jax.block_until_ready(out)

    # Reference: per-position linear == Conv1d(k=1) with the two permutes.
    ref = jnp.einsum("bli,oi->blo", x, weight) + bias[None, None, :]
    assert out.shape == (B, L, out_channel)
    assert jnp.allclose(out, ref, atol=1e-5, rtol=1e-5)

    print("KERNEL_OK")
</pallas_src>

<mosaic_0001>
module attributes {stable_mosaic.version = 11 : i64} {
  func.func @_conv1x1_kernel(%arg0: i32, %arg1: memref<8x256xf32, #tpu.memory_space<vmem>>, %arg2: memref<256x256xf32, #tpu.memory_space<vmem>>, %arg3: memref<1x256xf32, #tpu.memory_space<vmem>>, %arg4: memref<8x256xf32, #tpu.memory_space<vmem>>) attributes {dimension_semantics = [#tpu.dimension_semantics<parallel>], iteration_bounds = array<i64: 1>, scalar_prefetch = 0 : i64, scratch_operands = 0 : i64, tpu.core_type = #tpu.core_type<tc>, window_params = [{transform_indices = @transform_0, window_bounds = array<i64: 8, 256>}, {pipeline_mode = #tpu.pipeline_mode<synchronous>, transform_indices = @transform_1, window_bounds = array<i64: 256, 256>}, {pipeline_mode = #tpu.pipeline_mode<synchronous>, transform_indices = @transform_2, window_bounds = array<i64: 1, 256>}, {transform_indices = @transform_3, window_bounds = array<i64: 8, 256>}]} {
    %c0 = arith.constant 0 : index
    %c0_0 = arith.constant 0 : index
    %0 = vector.load %arg1[%c0, %c0_0] : memref<8x256xf32, #tpu.memory_space<vmem>>, vector<8x256xf32>
    %c0_1 = arith.constant 0 : index
    %c0_2 = arith.constant 0 : index
    %1 = vector.load %arg2[%c0_1, %c0_2] : memref<256x256xf32, #tpu.memory_space<vmem>>, vector<256x256xf32>
    %cst = arith.constant dense<0.000000e+00> : vector<8x256xf32>
    %2 = tpu.matmul %0, %1, %cst {dimension_numbers = #tpu.dot_dimension_numbers<[1], [0], [0], [1], [0, 0, 1, 1], [], []>} : vector<8x256xf32>, vector<256x256xf32>, vector<8x256xf32> -> vector<8x256xf32>
    %c0_3 = arith.constant 0 : index
    %c0_4 = arith.constant 0 : index
    %3 = vector.load %arg3[%c0_3, %c0_4] : memref<1x256xf32, #tpu.memory_space<vmem>>, vector<1x256xf32>
    %4 = vector.broadcast %3 : vector<1x256xf32> to vector<8x256xf32>
    %5 = arith.addf %2, %4 : vector<8x256xf32>
    %c0_5 = arith.constant 0 : index
    %c0_6 = arith.constant 0 : index
    %6 = vector.load %arg4[%c0_5, %c0_6] : memref<8x256xf32, #tpu.memory_space<vmem>>, vector<8x256xf32>
    tpu.vector_store %arg4[%c0_5, %c0_6], %5 {strides = array<i32>} : memref<8x256xf32, #tpu.memory_space<vmem>>, vector<8x256xf32>,
    return
  }
  func.func @transform_0(%arg0: i32) -> (i32, i32) {
    %c0_i32 = arith.constant 0 : i32
    %c0_i32_0 = arith.constant 0 : i32
    return %arg0, %c0_i32 : i32, i32
  }
  func.func @transform_1(%arg0: i32) -> (i32, i32) {
    %c0_i32 = arith.constant 0 : i32
    %c0_i32_0 = arith.constant 0 : i32
    %c0_i32_1 = arith.constant 0 : i32
    return %c0_i32, %c0_i32_0 : i32, i32
  }
  func.func @transform_2(%arg0: i32) -> (i32, i32) {
    %c0_i32 = arith.constant 0 : i32
    %c0_i32_0 = arith.constant 0 : i32
    %c0_i32_1 = arith.constant 0 : i32
    return %c0_i32, %c0_i32_0 : i32, i32
  }
  func.func @transform_3(%arg0: i32) -> (i32, i32) {
    %c0_i32 = arith.constant 0 : i32
    %c0_i32_0 = arith.constant 0 : i32
    return %arg0, %c0_i32 : i32, i32
  }
}

</mosaic_0001>

<bundles_post_ra>
// kernel: tpu_custom_call.1
= control target key start
LH: loop header
LB: loop body
LE: loop exit
PB: predicated region body
PF: predicated region fallthrough
CT: control target
= control target key end

     0   :  { %8 = vsyncpa [#allocation3], 0  ;;  %s420_s0 = inlined_call_operand.hbm [shape: f32[8,256], index: 0, kind: input, shape index: {}]   ;;  %s421_s1 = inlined_call_operand.hbm [shape: f32[256,256], index: 1, kind: input, shape index: {}]   ;;  %s422_s2 = inlined_call_operand.vmem [shape: f32[1,256], index: 2, kind: input, shape index: {}]   ;;  %s423_s3 = inlined_call_operand.hbm [shape: f32[8,256], index: 3, kind: output, shape index: {}]  }
   0x1   :  { %9 = vsyncpa [#allocation6], 0 }
   0x2   :  { %10 = vsyncpa [#allocation4], 0  ;;  %s349_s12 = smov [#allocation2]   ;;  %s350_s14 = smov [#allocation5]  }
   0x3   :  { %s17_s13 = sshll.u32 %s349_s12, 4  ;;  %s26_s15 = sshll.u32 %s350_s14, 4  ;;  %s18_s13 = int_to_ptr.vmem [resolvable:$true] %s17_s13  ;;  %s374_s15 = int_to_ptr.vmem [resolvable:$true] %s26_s15 }
   0x4   :  { %s277_s18 = scalar_lea.hbm %s420_s0, 256 }
   0x5   :  { %p278_p0 = scmp.ne.s32.totalorder %s420_s0, %s277_s18  ;;  %p281_p1 = scmp.lt.u32.totalorder %s277_s18, %s420_s0 }
   0x7   :  { %p283_p2 = pnand %p281_p1, %p278_p0 }
   0x9   :  { %286 = shalt.err (!%p283_p2)
}
   0xa   :  { %s287_s23 = scalar_lea.vmem %s18_s13, 256  ;;  %p292_p4 = scmp.lt.s32.totalorder %s18_s13, %s18_s13 }
   0xb   :  { %p288_p3 = scmp.ne.s32.totalorder %s18_s13, %s287_s23  ;;  %p293_p5 = scmp.lt.s32.totalorder %s287_s23, %s287_s23 }
   0xd   :  { %p294_p6 = por %p293_p5, %p292_p4 }
   0xf   :  { %p295_p7 = pnand %p294_p6, %p288_p3 }
  0x11   :  { %298 = shalt.err (!%p295_p7)
}
  0x12   :  { %20 = dma.hbm_to_vmem [thread:$0]  %s420_s0, 256, %s18_s13, [#allocation3]  }
  0x13   :  { %s299_s28 = scalar_lea.hbm %s421_s1, 8192 }
  0x14   :  { %p300_p8 = scmp.ne.s32.totalorder %s421_s1, %s299_s28  ;;  %p303_p9 = scmp.lt.u32.totalorder %s299_s28, %s421_s1 }
  0x16   :  { %p305_p10 = pnand %p303_p9, %p300_p8 }
  0x18   :  { %308 = shalt.err (!%p305_p10)
}
  0x19   :  { %s309_s6 = scalar_lea.vmem %s374_s15, 8192  ;;  %p314_p12 = scmp.lt.s32.totalorder %s374_s15, %s374_s15 }
  0x1a   :  { %p310_p11 = scmp.ne.s32.totalorder %s374_s15, %s309_s6  ;;  %p315_p13 = scmp.lt.s32.totalorder %s309_s6, %s309_s6 }
  0x1c   :  { %p316_p0 = por %p315_p13, %p314_p12 }
  0x1e   :  { %p317_p1 = pnand %p316_p0, %p310_p11 }
  0x20   :  { %320 = shalt.err (!%p317_p1)
}
  0x21   :  { %s351_s0 = smov 256   ;;  %s352_s7 = smov 16  }
  0x22   :  { %32 = dma.hbm_to_vmem [thread:$0]  %s421_s1, 8192, %s374_s15, [#allocation6], %s351_s0, %s351_s0, %s352_s7  }
  0x23   :  { %343 = dma.done.wait [#allocation3], 256  }
  0x24   :  { %344 = vsyncadd [#allocation3], 4294967040 }
  0x25   :  { %345 = dma.done.wait [#allocation6], 8192  }
  0x26   :  { %346 = vsyncadd [#allocation6], 4294959104  ;;  %v44_v0 = vld [vmem:[#allocation5 + $0x8] sm:$0xff]  ;;  %v46_v1 = vld [vmem:[#allocation5 + $0x18] sm:$0xff]  ;;  %s353_s11 = smov [#allocation7]  }
  0x27   :  { %v43_v2 = vld [vmem:[#allocation5] sm:$0xff]  ;;  %v208_v3 = vpack.c.bf16 %v46_v1, %v44_v0  ;;  %v45_v4 = vld [vmem:[#allocation5 + $0x10] sm:$0xff]  ;;  %v48_v5 = vld [vmem:[#allocation5 + $0x28] sm:$0xff]  ;;  %s198_s12 = sshll.u32 %s353_s11, 4  ;;  %s199_s12 = int_to_ptr.vmem [resolvable:$true] %s198_s12 }
  0x28   :  { %v50_v6 = vld [vmem:[#allocation5 + $0x38] sm:$0xff]  ;;  %v210_v7 = vpack.c.bf16 %v45_v4, %v43_v2  ;;  %v47_v9 = vld [vmem:[#allocation5 + $0x20] sm:$0xff]  ;;  %v49_v10 = vld [vmem:[#allocation5 + $0x30] sm:$0xff]  ;;  %s321_s13 = scalar_lea.vmem %s199_s12, 256  ;;  %p326_p3 = scmp.lt.s32.totalorder %s199_s12, %s199_s12 }
  0x29   :  { %v212_v8 = vpack.c.bf16 %v50_v6, %v48_v5  ;;  %v52_v11 = vld [vmem:[#allocation5 + $0x48] sm:$0xff]  ;;  %209 = vmatprep.subr.bf16.mxu0 %v208_v3  ;;  %v54_v12 = vld [vmem:[#allocation5 + $0x58] sm:$0xff]  ;;  %v214_v13 = vpack.c.bf16 %v49_v10, %v47_v9  ;;  %v51_v15 = vld [vmem:[#allocation5 + $0x40] sm:$0xff]  ;;  %p322_p2 = scmp.ne.s32.totalorder %s199_s12, %s321_s13  ;;  %p327_p4 = scmp.lt.s32.totalorder %s321_s13, %s321_s13 }
  0x2a   :  { %211 = vmatpush1.bf16.msra.mxu0 %v210_v7  ;;  %v216_v14 = vpack.c.bf16 %v54_v12, %v52_v11  ;;  %v53_v16 = vld [vmem:[#allocation5 + $0x50] sm:$0xff]  ;;  %v56_v17 = vld [vmem:[#allocation5 + $0x68] sm:$0xff]  ;;  %v58_v18 = vld [vmem:[#allocation5 + $0x78] sm:$0xff] }
  0x2b   :  { %213 = vmatprep.subr.bf16.mxu0 %v212_v8  ;;  %v218_v19 = vpack.c.bf16 %v53_v16, %v51_v15  ;;  %v220_v20 = vpack.c.bf16 %v58_v18, %v56_v17  ;;  %v55_v21 = vld [vmem:[#allocation5 + $0x60] sm:$0xff]  ;;  %v57_v22 = vld [vmem:[#allocation5 + $0x70] sm:$0xff]  ;;  %v60_v23 = vld [vmem:[#allocation5 + $0x88] sm:$0xff]  ;;  %p328_p5 = por %p327_p4, %p326_p3 }
  0x2c   :  { %v62_v24 = vld [vmem:[#allocation5 + $0x98] sm:$0xff]  ;;  %v222_v25 = vpack.c.bf16 %v57_v22, %v55_v21  ;;  %v59_v27 = vld [vmem:[#allocation5 + $0x80] sm:$0xff]  ;;  %v61_v28 = vld [vmem:[#allocation5 + $0x90] sm:$0xff] }
  0x2d   :  { %v224_v26 = vpack.c.bf16 %v62_v24, %v60_v23  ;;  %v64_v29 = vld [vmem:[#allocation5 + $0xa8] sm:$0xff]  ;;  %v66_v30 = vld [vmem:[#allocation5 + $0xb8] sm:$0xff]  ;;  %v226_v31 = vpack.c.bf16 %v61_v28, %v59_v27  ;;  %v63_v33 = vld [vmem:[#allocation5 + $0xa0] sm:$0xff]  ;;  %p329_p6 = pnand %p328_p5, %p322_p2 }
  0x2e   :  { %215 = vmatpush1.bf16.msra.mxu0 %v214_v13  ;;  %v228_v32 = vpack.c.bf16 %v66_v30, %v64_v29  ;;  %v65_v34 = vld [vmem:[#allocation5 + $0xb0] sm:$0xff]  ;;  %v68_v35 = vld [vmem:[#allocation5 + $0xc8] sm:$0xff]  ;;  %v70_v36 = vld [vmem:[#allocation5 + $0xd8] sm:$0xff] }
  0x2f   :  { %217 = vmatprep.subr.bf16.mxu0 %v216_v14  ;;  %v230_v37 = vpack.c.bf16 %v65_v34, %v63_v33  ;;  %v232_v38 = vpack.c.bf16 %v70_v36, %v68_v35  ;;  %v67_v39 = vld [vmem:[#allocation5 + $0xc0] sm:$0xff]  ;;  %v69_v40 = vld [vmem:[#allocation5 + $0xd0] sm:$0xff]  ;;  %v42_v41 = vld [vmem:[#allocation2 + $0x8] sm:$0xff]  ;;  %v109_v34 = vlaneseq }
  0x30   :  { %v72_v42 = vld [vmem:[#allocation5 + $0xe8] sm:$0xff]  ;;  %v74_v43 = vld [vmem:[#allocation5 + $0xf8] sm:$0xff]  ;;  %183 = vmatprep.mubr.f32.mxu0 %v42_v41  ;;  %v234_v44 = vpack.c.bf16 %v69_v40, %v67_v39  ;;  %v71_v46 = vld [vmem:[#allocation5 + $0xe0] sm:$0xff] }
  0x31   :  { %v236_v45 = vpack.c.bf16 %v74_v43, %v72_v42  ;;  %v73_v47 = vld [vmem:[#allocation5 + $0xf0] sm:$0xff]  ;;  %v76_v48 = vld [vmem:[#allocation5 + $0x108] sm:$0xff]  ;;  %v78_v49 = vld [vmem:[#allocation5 + $0x118] sm:$0xff]  ;;  %v110_v35 = vshrl.u32 %v109_v34, 7 }
  0x32   :  { %219 = vmatpush1.bf16.msra.mxu0 %v218_v19  ;;  %v238_v50 = vpack.c.bf16 %v73_v47, %v71_v46  ;;  %v240_v51 = vpack.c.bf16 %v78_v49, %v76_v48  ;;  %v75_v52 = vld [vmem:[#allocation5 + $0x100] sm:$0xff]  ;;  %v77_v53 = vld [vmem:[#allocation5 + $0x110] sm:$0xff]  ;;  %v80_v54 = vld [vmem:[#allocation5 + $0x128] sm:$0xff] }
  0x33   :  { %221 = vmatprep.subr.bf16.mxu0 %v220_v20  ;;  %v82_v55 = vld [vmem:[#allocation5 + $0x138] sm:$0xff]  ;;  %v242_v56 = vpack.c.bf16 %v77_v53, %v75_v52  ;;  %v79_v58 = vld [vmem:[#allocation5 + $0x120] sm:$0xff]  ;;  %v81_v59 = vld [vmem:[#allocation5 + $0x130] sm:$0xff]  ;;  %v111_v36 = vsub.s32 0, %v110_v35 }
  0x34   :  { %v244_v57 = vpack.c.bf16 %v82_v55, %v80_v54  ;;  %v84_v60 = vld [vmem:[#allocation5 + $0x148] sm:$0xff]  ;;  %v86_v61 = vld [vmem:[#allocation5 + $0x158] sm:$0xff]  ;;  %v246_v62 = vpack.c.bf16 %v81_v59, %v79_v58  ;;  %v83_v0 = vld [vmem:[#allocation5 + $0x140] sm:$0xff] }
  0x35   :  { %v248_v63 = vpack.c.bf16 %v86_v61, %v84_v60  ;;  %v85_v1 = vld [vmem:[#allocation5 + $0x150] sm:$0xff]  ;;  %v88_v2 = vld [vmem:[#allocation5 + $0x168] sm:$0xff]  ;;  %v90_v3 = vld [vmem:[#allocation5 + $0x178] sm:$0xff] }
  0x36   :  { %223 = vmatpush1.bf16.msra.mxu0 %v222_v25  ;;  %v250_v4 = vpack.c.bf16 %v85_v1, %v83_v0  ;;  %v252_v5 = vpack.c.bf16 %v90_v3, %v88_v2  ;;  %v87_v6 = vld [vmem:[#allocation5 + $0x160] sm:$0xff]  ;;  %v89_v7 = vld [vmem:[#allocation5 + $0x170] sm:$0xff]  ;;  %v92_v8 = vld [vmem:[#allocation5 + $0x188] sm:$0xff] }
  0x37   :  { %225 = vmatprep.subr.bf16.mxu0 %v224_v26  ;;  %v94_v9 = vld [vmem:[#allocation5 + $0x198] sm:$0xff]  ;;  %v254_v10 = vpack.c.bf16 %v89_v7, %v87_v6  ;;  %v91_v12 = vld [vmem:[#allocation5 + $0x180] sm:$0xff]  ;;  %v93_v13 = vld [vmem:[#allocation5 + $0x190] sm:$0xff] }
  0x38   :  { %v256_v11 = vpack.c.bf16 %v94_v9, %v92_v8  ;;  %v96_v14 = vld [vmem:[#allocation5 + $0x1a8] sm:$0xff]  ;;  %v98_v15 = vld [vmem:[#allocation5 + $0x1b8] sm:$0xff]  ;;  %v258_v16 = vpack.c.bf16 %v93_v13, %v91_v12  ;;  %v95_v18 = vld [vmem:[#allocation5 + $0x1a0] sm:$0xff] }
  0x39   :  { %v260_v17 = vpack.c.bf16 %v98_v15, %v96_v14  ;;  %v97_v19 = vld [vmem:[#allocation5 + $0x1b0] sm:$0xff]  ;;  %v100_v20 = vld [vmem:[#allocation5 + $0x1c8] sm:$0xff]  ;;  %v102_v21 = vld [vmem:[#allocation5 + $0x1d8] sm:$0xff] }
  0x3a   :  { %227 = vmatpush1.bf16.msra.mxu0 %v226_v31  ;;  %v262_v22 = vpack.c.bf16 %v97_v19, %v95_v18  ;;  %v264_v23 = vpack.c.bf16 %v102_v21, %v100_v20  ;;  %v99_v24 = vld [vmem:[#allocation5 + $0x1c0] sm:$0xff]  ;;  %v101_v25 = vld [vmem:[#allocation5 + $0x1d0] sm:$0xff]  ;;  %v104_v26 = vld [vmem:[#allocation5 + $0x1e8] sm:$0xff] }
  0x3b   :  { %229 = vmatprep.subr.bf16.mxu0 %v228_v32  ;;  %v106_v27 = vld [vmem:[#allocation5 + $0x1f8] sm:$0xff]  ;;  %v266_v28 = vpack.c.bf16 %v101_v25, %v99_v24  ;;  %v103_v30 = vld [vmem:[#allocation5 + $0x1e0] sm:$0xff]  ;;  %v105_v31 = vld [vmem:[#allocation5 + $0x1f0] sm:$0xff] }
  0x3c   :  { %v268_v29 = vpack.c.bf16 %v106_v27, %v104_v26  ;;  %v270_v32 = vpack.c.bf16 %v105_v31, %v103_v30  ;;  %v41_v33 = vld [vmem:[#allocation2] sm:$0xff] }
  0x3e   :  { %231 = vmatpush1.bf16.msra.mxu0 %v230_v37  ;;  %v107_v37 = vld [vmem:[%s422_s2] sm:$0x3] }
  0x3f   :  { %233 = vmatprep.subr.bf16.mxu0 %v232_v38  ;;  %v115_v38 = vsub.s32 1, %v110_v35  ;;  %v112_v39 = vrot.slane %v107_v37, %v111_v36 }
  0x41   :  { %v116_v40 = vrot.slane %v107_v37, %v115_v38 }
  0x42   :  { %235 = vmatpush1.bf16.msra.mxu0 %v234_v44 }
  0x43   :  { %237 = vmatprep.subr.bf16.mxu0 %v236_v45 }
  0x46   :  { %239 = vmatpush1.bf16.msra.mxu0 %v238_v50 }
  0x47   :  { %241 = vmatprep.subr.bf16.mxu0 %v240_v51 }
  0x4a   :  { %243 = vmatpush1.bf16.msra.mxu0 %v242_v56 }
  0x4b   :  { %245 = vmatprep.subr.bf16.mxu0 %v244_v57 }
  0x4e   :  { %247 = vmatpush1.bf16.msra.mxu0 %v246_v62 }
  0x4f   :  { %249 = vmatprep.subr.bf16.mxu0 %v248_v63 }
  0x52   :  { %251 = vmatpush1.bf16.msra.mxu0 %v250_v4 }
  0x53   :  { %253 = vmatprep.subr.bf16.mxu0 %v252_v5 }
  0x56   :  { %255 = vmatpush1.bf16.msra.mxu0 %v254_v10 }
  0x57   :  { %257 = vmatprep.subr.bf16.mxu0 %v256_v11 }
  0x5a   :  { %259 = vmatpush1.bf16.msra.mxu0 %v258_v16 }
  0x5b   :  { %261 = vmatprep.subr.bf16.mxu0 %v260_v17 }
  0x5e   :  { %263 = vmatpush1.bf16.msra.mxu0 %v262_v22 }
  0x5f   :  { %265 = vmatprep.subr.bf16.mxu0 %v264_v23 }
  0x62   :  { %267 = vmatpush1.bf16.msra.mxu0 %v266_v28 }
  0x63   :  { %269 = vmatprep.subr.bf16.mxu0 %v268_v29 }
  0x66   :  { %271 = vmatpush1.bf16.msra.mxu0 %v270_v32 }
  0x69   :  { %184 = vmatmul.mubr.f32.vlgmr.msra.gmra.mrb[0].mxu0 %v41_v33 }
 0x13c   :  { %v185_v41 = vpop.f32.mrb[0].mxu0 }
 0x13d   :  { %v186_v42 = vadd.f32 %v185_v41, %v112_v39  ;;  %v187_v43 = vpop.f32.mrb[1].mxu0 }
 0x13e   :  { %v188_v44 = vadd.f32 %v187_v43, %v116_v40 }
 0x13f   :  { %190 = vst [vmem:[#allocation7] sm:$0xff] %v186_v42 }
 0x140   :  { %191 = vst [vmem:[#allocation7 + $0x8] sm:$0xff] %v188_v44 }
 0x141   :  { %332 = shalt.err (!%p329_p6)
}
 0x142   :  { %s333_s15 = scalar_lea.hbm %s423_s3, 256 }
 0x143   :  { %p334_p7 = scmp.ne.s32.totalorder %s423_s3, %s333_s15  ;;  %p337_p8 = scmp.lt.u32.totalorder %s333_s15, %s423_s3 }
 0x145   :  { %p339_p9 = pnand %p337_p8, %p334_p7 }
 0x147   :  { %342 = shalt.err (!%p339_p9)
}
 0x148   :  { %201 = dma.vmem_to_hbm [thread:$0]  %s199_s12, 256, %s423_s3, [#allocation4]  }
 0x149   :  { %347 = dma.done.wait [#allocation4], 256  }
 0x14a   :  { %348 = vsyncadd [#allocation4], 4294967040 }
 0x14b   :  { %205 = vsyncpa [#allocation3], 1 }
 0x14c   :  { %206 = vsyncpa [#allocation6], 1 }
 0x14d   :  { %207 = vsyncpa [#allocation4], 1 }

</bundles_post_ra>
